<compile_context>
chip_gen: v7x
topology: tpu7x:2x2x1
jax: 0.10.0
libtpu: 0.0.40
codegen_flags: <defaults>
</compile_context>

<pallas_src>
import functools
import math

import jax
import jax.numpy as jnp
from jax.experimental import pallas as pl
from jax.experimental.pallas import tpu as pltpu

EPS = 1e-5


# ---------------------------------------------------------------------------
# Hardware-aware sizing helpers
# ---------------------------------------------------------------------------
def _round_up(n, m):
    return ((n + m - 1) // m) * m


@functools.lru_cache(maxsize=1)
def _vmem_capacity_bytes():
    """Per-TensorCore VMEM capacity; conservative (v7x) fallback."""
    try:
        cap = int(getattr(pltpu.get_tpu_info(), "vmem_capacity_bytes", 0))
        if cap > 0:
            return cap
    except Exception:
        pass
    return 64 << 20


def _vmem_limit(live_bytes):
    cap = _vmem_capacity_bytes()
    want = int(1.5 * live_bytes) + (4 << 20)
    return int(min(max(want, 16 << 20), int(cap * 0.9)))


def _choose_row_tile(rows, per_row_bytes, budget):
    """Row tile for streaming activations (double-buffered), multiple of 8."""
    rows8 = _round_up(rows, 8)
    tile = budget // max(2 * per_row_bytes, 1)
    tile = max((tile // 8) * 8, 8)
    return int(min(tile, rows8))


def _choose_col_tile(c_in, c_out, w_itemsize, budget):
    """Output-column tile for the (C_in, tn) weight block: either the full
    C_out or a multiple of 128 (lane constraint)."""
    if 2 * c_in * c_out * w_itemsize <= budget or c_out <= 256:
        return int(c_out)
    tn = (budget // (2 * c_in * w_itemsize)) // 128 * 128
    return int(max(min(tn, c_out), 128))


def _choose_seq_tile(seq, target_rows):
    """Sequence tile that exactly divides `seq` (multiple of 8), else full."""
    if seq <= target_rows:
        return int(seq)
    start = max((target_rows // 8) * 8, 8)
    for cand in range(start, 7, -8):
        if seq % cand == 0:
            return int(cand)
    # TODO(synk): mask padded KV rows so non-divisor sequence lengths can be
    # tiled too; fall back to the full sequence for now.
    return int(seq)


# ---------------------------------------------------------------------------
# Fused (LayerNorm ->) Linear (-> sigmoid) (-> + residual)
# ---------------------------------------------------------------------------
def _fused_linear_kernel(*refs, has_ln, act, has_residual):
    idx = 0
    x_ref = refs[idx]; idx += 1
    if has_ln:
        lnw_ref = refs[idx]; lnb_ref = refs[idx + 1]; idx += 2
    w_ref = refs[idx]; b_ref = refs[idx + 1]; idx += 2
    if has_residual:
        r_ref = refs[idx]; idx += 1
    o_ref = refs[idx]; idx += 1
    if has_ln:
        xn_ref = refs[idx]; idx += 1

    if has_ln:
        # LayerNorm the row tile once per row-block (column block j == 0),
        # cache it in VMEM scratch, reuse for every weight column block.
        @pl.when(pl.program_id(1) == 0)
        def _():
            x = x_ref[...].astype(jnp.float32)
            mean = jnp.mean(x, axis=-1, keepdims=True)
            xc = x - mean
            var = jnp.mean(xc * xc, axis=-1, keepdims=True)  # two-pass (stable)
            y = xc * jax.lax.rsqrt(var + EPS) * lnw_ref[...] + lnb_ref[...]
            xn_ref[...] = y.astype(xn_ref.dtype)
        xin = xn_ref[...]
    else:
        xin = x_ref[...]

    # Native-dtype operands on the MXU; f32 accumulation.
    y = jnp.dot(xin, w_ref[...], preferred_element_type=jnp.float32)
    y = y + b_ref[...].astype(jnp.float32)
    if act == "sigmoid":
        y = jax.nn.sigmoid(y)
    if has_residual:
        y = y + r_ref[...].astype(jnp.float32)
    o_ref[...] = y.astype(o_ref.dtype)


def fused_linear(x2, weight, bias, *, ln_w=None, ln_b=None, activation="none",
                 residual=None):
    """y = LN?(x2) @ weight + bias, optional sigmoid, optional (+ residual).

    x2: (R, C_in), weight: (C_in, C_out), bias: (C_out,), residual: (R, C_out).
    """
    R, C_in = x2.shape
    C_out = weight.shape[1]
    x_item = jnp.dtype(x2.dtype).itemsize
    w_item = jnp.dtype(weight.dtype).itemsize
    has_ln = ln_w is not None
    has_res = residual is not None

    cap = _vmem_capacity_bytes()
    act_budget = max(cap // 4, 8 << 20)    # activation blocks
    w_budget = max(cap // 4, 8 << 20)      # weight blocks

    per_row = (C_in + C_out + (C_out if has_res else 0)) * x_item
    if has_ln:
        per_row += C_in * x_item           # LN scratch
    row_tile = _choose_row_tile(R, per_row, act_budget)
    tn = _choose_col_tile(C_in, C_out, w_item, w_budget)
    n_row = pl.cdiv(R, row_tile)
    n_col = pl.cdiv(C_out, tn)

    args = [x2]
    in_specs = [pl.BlockSpec((row_tile, C_in), lambda i, j: (i, 0))]
    if has_ln:
        args += [ln_w.reshape(1, C_in).astype(jnp.float32),
                 ln_b.reshape(1, C_in).astype(jnp.float32)]
        in_specs += [pl.BlockSpec((1, C_in), lambda i, j: (0, 0)),
                     pl.BlockSpec((1, C_in), lambda i, j: (0, 0))]
    args += [weight, bias.reshape(1, C_out)]
    in_specs += [pl.BlockSpec((C_in, tn), lambda i, j: (0, j)),
                 pl.BlockSpec((1, tn), lambda i, j: (0, j))]
    if has_res:
        args.append(residual)
        in_specs.append(pl.BlockSpec((row_tile, tn), lambda i, j: (i, j)))

    scratch_shapes = []
    if has_ln:
        scratch_shapes.append(pltpu.VMEM((row_tile, C_in), x2.dtype))

    live = (2 * row_tile * C_in * x_item
            + 2 * (C_in * tn + tn) * w_item
            + 2 * row_tile * tn * x_item
            + (2 * row_tile * tn * x_item if has_res else 0)
            + (row_tile * C_in * x_item + 4 * C_in * 4 if has_ln else 0)
            + 2 * row_tile * tn * 4)

    flops = 2 * R * C_in * C_out
    transcendentals = (R if has_ln else 0) + (R * C_out if activation == "sigmoid" else 0)
    bytes_accessed = (R * C_in + C_in * C_out + C_out + R * C_out
                      + (R * C_out if has_res else 0)) * x_item

    # TODO(synk): also tile the contraction (K) dim with an f32 accumulator for
    # very large C_in; with LN fused the full row is resident anyway.
    out = pl.pallas_call(
        functools.partial(_fused_linear_kernel, has_ln=has_ln, act=activation,
                          has_residual=has_res),
        out_shape=jax.ShapeDtypeStruct((R, C_out), x2.dtype),
        grid_spec=pltpu.PrefetchScalarGridSpec(
            num_scalar_prefetch=0,
            grid=(n_row, n_col),
            in_specs=in_specs,
            out_specs=pl.BlockSpec((row_tile, tn), lambda i, j: (i, j)),
            scratch_shapes=scratch_shapes,
        ),
        compiler_params=pltpu.CompilerParams(
            dimension_semantics=("parallel", "arbitrary"),
            vmem_limit_bytes=_vmem_limit(live),
        ),
        cost_estimate=pl.CostEstimate(
            flops=int(flops),
            transcendentals=int(transcendentals),
            bytes_accessed=int(bytes_accessed),
        ),
    )(*args)
    return out


# ---------------------------------------------------------------------------
# Attention (non-causal, matching the reference which passes is_causal=False)
# ---------------------------------------------------------------------------
def _attention_kernel(q_ref, kv_ref, o_ref, m_ref, l_ref, acc_ref,
                      *, n_head, hd, scale, kv_steps):
    C = n_head * hd
    kv_idx = pl.program_id(2)

    @pl.when(kv_idx == 0)
    def _():
        m_ref[...] = jnp.full_like(m_ref, -jnp.inf)
        l_ref[...] = jnp.zeros_like(l_ref)
        acc_ref[...] = jnp.zeros_like(acc_ref)

    q_all = q_ref[0]        # (tq, 3C) -- q columns [0:C]
    kv_all = kv_ref[0]      # (tkv, 3C) -- k in [C:2C], v in [2C:3C]
    m_all = m_ref[...]
    l_all = l_ref[...]
    acc_all = acc_ref[...]

    m_out, l_out, acc_out = [], [], []
    for h in range(n_head):
        q_h = q_all[:, h * hd:(h + 1) * hd]
        k_h = kv_all[:, C + h * hd:C + (h + 1) * hd]
        v_h = kv_all[:, 2 * C + h * hd:2 * C + (h + 1) * hd]
        # Fold the 1/sqrt(hd) scale into q: O(tq*hd) instead of O(tq*tkv).
        q_h = (q_h.astype(jnp.float32) * scale).astype(q_h.dtype)
        s = jax.lax.dot_general(q_h, k_h, (((1,), (1,)), ((), ())),
                                preferred_element_type=jnp.float32)   # (tq, tkv)
        m_prev = m_all[:, h:h + 1]
        l_prev = l_all[:, h:h + 1]
        acc_prev = acc_all[:, h * hd:(h + 1) * hd]
        m_new = jnp.maximum(m_prev, jnp.max(s, axis=-1, keepdims=True))
        alpha = jnp.exp(m_prev - m_new)
        p = jnp.exp(s - m_new)
        l_new = alpha * l_prev + jnp.sum(p, axis=-1, keepdims=True)
        acc_new = alpha * acc_prev + jnp.dot(p.astype(v_h.dtype), v_h,
                                             preferred_element_type=jnp.float32)
        m_out.append(m_new)
        l_out.append(l_new)
        acc_out.append(acc_new)

    m_ref[...] = jnp.concatenate(m_out, axis=-1)
    l_ref[...] = jnp.concatenate(l_out, axis=-1)
    acc_ref[...] = jnp.concatenate(acc_out, axis=-1)

    @pl.when(kv_idx == kv_steps - 1)
    def _():
        l_fin = l_ref[...]
        acc_fin = acc_ref[...]
        outs = []
        for h in range(n_head):
            inv = pl.reciprocal(l_fin[:, h:h + 1], approx=True)   # EUP slot
            outs.append(acc_fin[:, h * hd:(h + 1) * hd] * inv)
        o_ref[0] = jnp.concatenate(outs, axis=-1).astype(o_ref.dtype)


def attention(qkv, n_head):
    """softmax(q k^T / sqrt(hd)) @ v straight from the (B, T, 3C) qkv buffer,
    writing a lane-dense (B, T, C) output (no head-split transposes)."""
    B, T, three_c = qkv.shape
    C = three_c // 3
    hd = C // n_head
    scale = 1.0 / math.sqrt(hd)
    itemsize = jnp.dtype(qkv.dtype).itemsize

    cap = _vmem_capacity_bytes()
    blk_target = max(cap // 16, 2 << 20)
    seq_target = max(blk_target // max(3 * C * itemsize, 1), 8)
    tq = _choose_seq_tile(T, seq_target)
    tkv = _choose_seq_tile(T, seq_target)
    n_q = T // tq
    n_kv = T // tkv

    live = (2 * tq * 3 * C * itemsize      # q block
            + 2 * tkv * 3 * C * itemsize   # kv block
            + 2 * tq * C * itemsize        # out block
            + tq * (C + 2 * n_head) * 4    # scratch
            + 4 * tq * tkv * 4)            # score / p temporaries (per head)

    kernel = functools.partial(_attention_kernel, n_head=n_head, hd=hd,
                               scale=scale, kv_steps=n_kv)
    out = pl.pallas_call(
        kernel,
        out_shape=jax.ShapeDtypeStruct((B, T, C), qkv.dtype),
        grid_spec=pltpu.PrefetchScalarGridSpec(
            num_scalar_prefetch=0,
            grid=(B, n_q, n_kv),
            in_specs=[
                pl.BlockSpec((1, tq, three_c), lambda b, qi, ki: (b, qi, 0)),
                pl.BlockSpec((1, tkv, three_c), lambda b, qi, ki: (b, ki, 0)),
            ],
            out_specs=pl.BlockSpec((1, tq, C), lambda b, qi, ki: (b, qi, 0)),
            scratch_shapes=[
                pltpu.VMEM((tq, n_head), jnp.float32),   # running max
                pltpu.VMEM((tq, n_head), jnp.float32),   # running denom
                pltpu.VMEM((tq, C), jnp.float32),        # running output acc
            ],
        ),
        compiler_params=pltpu.CompilerParams(
            dimension_semantics=("parallel", "parallel", "arbitrary"),
            vmem_limit_bytes=_vmem_limit(live),
        ),
        cost_estimate=pl.CostEstimate(
            flops=int(4 * B * n_head * T * T * hd),
            transcendentals=int(B * n_head * T * T),
            bytes_accessed=int(B * T * (3 * C + C) * itemsize),
        ),
    )(qkv, qkv)
    return out


# ---------------------------------------------------------------------------
# Block forward
# ---------------------------------------------------------------------------
def block_forward(x, params, n_head):
    B, T, C = x.shape
    x2 = x.reshape(B * T, C)

    # x = x + attn(ln_1(x)) : ln_1 fused into c_attn; qkv stays in its natural
    # (B, T, 3C) layout and attention writes directly into (B, T, C).
    qkv = fused_linear(x2, params["attn_w"], params["attn_b"],
                       ln_w=params["ln1_w"], ln_b=params["ln1_b"])
    y = attention(qkv.reshape(B, T, 3 * C), n_head)                 # (B, T, C)
    x2 = fused_linear(y.reshape(B * T, C), params["proj_w"], params["proj_b"],
                      residual=x2)

    # x = x + mlp(ln_2(x)) : ln_2 fused into c_fc, sigmoid fused, residual fused.
    fc = fused_linear(x2, params["fc_w"], params["fc_b"],
                      ln_w=params["ln2_w"], ln_b=params["ln2_b"],
                      activation="sigmoid")
    x2 = fused_linear(fc, params["proj2_w"], params["proj2_b"], residual=x2)
    return x2.reshape(B, T, C)


# ---------------------------------------------------------------------------
# Demo / correctness check
# ---------------------------------------------------------------------------
if __name__ == "__main__":
    key = jax.random.PRNGKey(0)
    B, T, C, n_head = 2, 8, 32, 4
    ks = jax.random.split(key, 9)
    x = jax.random.normal(ks[0], (B, T, C), dtype=jnp.float32)

    def init_w(k, fan_in, fan_out):
        return jax.random.normal(k, (fan_in, fan_out), dtype=jnp.float32) / math.sqrt(fan_in)

    params = dict(
        ln1_w=jnp.ones((C,), jnp.float32), ln1_b=jnp.zeros((C,), jnp.float32),
        ln2_w=jnp.ones((C,), jnp.float32), ln2_b=jnp.zeros((C,), jnp.float32),
        attn_w=init_w(ks[1], C, 3 * C),
        attn_b=0.01 * jax.random.normal(ks[2], (3 * C,), dtype=jnp.float32),
        proj_w=init_w(ks[3], C, C),
        proj_b=0.01 * jax.random.normal(ks[4], (C,), dtype=jnp.float32),
        fc_w=init_w(ks[5], C, 4 * C),
        fc_b=0.01 * jax.random.normal(ks[6], (4 * C,), dtype=jnp.float32),
        proj2_w=init_w(ks[7], 4 * C, C),
        proj2_b=0.01 * jax.random.normal(ks[8], (C,), dtype=jnp.float32),
    )

    y = jax.block_until_ready(block_forward(x, params, n_head))

    # Pure-JAX reference mirroring the PyTorch Block.forward.
    def ref_ln(a, w, b):
        mu = jnp.mean(a, -1, keepdims=True)
        var = jnp.mean((a - mu) ** 2, -1, keepdims=True)
        return (a - mu) * jax.lax.rsqrt(var + EPS) * w + b

    def ref_block(a):
        hd = C // n_head
        h = ref_ln(a, params["ln1_w"], params["ln1_b"])
        qkv = h @ params["attn_w"] + params["attn_b"]
        q, k, v = jnp.split(qkv, 3, axis=-1)
        q = q.reshape(B, T, n_head, hd).transpose(0, 2, 1, 3)
        k = k.reshape(B, T, n_head, hd).transpose(0, 2, 1, 3)
        v = v.reshape(B, T, n_head, hd).transpose(0, 2, 1, 3)
        att = jnp.einsum("bhqd,bhkd->bhqk", q, k) / math.sqrt(hd)
        att = jax.nn.softmax(att, axis=-1)
        o = jnp.einsum("bhqk,bhkd->bhqd", att, v)
        o = o.transpose(0, 2, 1, 3).reshape(B, T, C)
        a = a + o @ params["proj_w"] + params["proj_b"]
        h2 = ref_ln(a, params["ln2_w"], params["ln2_b"])
        a = a + jax.nn.sigmoid(h2 @ params["fc_w"] + params["fc_b"]) @ params["proj2_w"] + params["proj2_b"]
        return a

    ref = ref_block(x)
    err = float(jnp.max(jnp.abs(y - ref)))
    # Tolerance accounts for the EUP approximate reciprocal in the softmax
    # normalization; layout/indexing bugs would show errors of O(1).
    assert err < 5e-3, f"max abs err {err}"
    print("KERNEL_OK")
</pallas_src>

<mosaic_0001>
module attributes {stable_mosaic.version = 11 : i64} {
  func.func @_fused_linear_kernel(%arg0: i32, %arg1: i32, %arg2: memref<16x32xf32, #tpu.memory_space<vmem>>, %arg3: memref<1x32xf32, #tpu.memory_space<vmem>>, %arg4: memref<1x32xf32, #tpu.memory_space<vmem>>, %arg5: memref<32x96xf32, #tpu.memory_space<vmem>>, %arg6: memref<1x96xf32, #tpu.memory_space<vmem>>, %arg7: memref<16x96xf32, #tpu.memory_space<vmem>>, %arg8: memref<16x32xf32, #tpu.memory_space<vmem>>) attributes {dimension_semantics = [#tpu.dimension_semantics<parallel>, #tpu.dimension_semantics<arbitrary>], iteration_bounds = array<i64: 1, 1>, scalar_prefetch = 0 : i64, scratch_operands = 1 : i64, tpu.core_type = #tpu.core_type<tc>, window_params = [{transform_indices = @transform_0, window_bounds = array<i64: 16, 32>}, {pipeline_mode = #tpu.pipeline_mode<synchronous>, transform_indices = @transform_1, window_bounds = array<i64: 1, 32>}, {pipeline_mode = #tpu.pipeline_mode<synchronous>, transform_indices = @transform_2, window_bounds = array<i64: 1, 32>}, {transform_indices = @transform_3, window_bounds = array<i64: 32, 96>}, {transform_indices = @transform_4, window_bounds = array<i64: 1, 96>}, {transform_indices = @transform_5, window_bounds = array<i64: 16, 96>}]} {
    %c0_i32 = arith.constant 0 : i32
    %0 = arith.cmpi eq, %arg1, %c0_i32 : i32
    %1 = arith.extui %0 : i1 to i32
    %c0_i32_0 = arith.constant 0 : i32
    %2 = arith.cmpi ne, %1, %c0_i32_0 : i32
    scf.if %2 {
      %c0_8 = arith.constant 0 : index
      %c0_9 = arith.constant 0 : index
      %10 = vector.load %arg2[%c0_8, %c0_9] : memref<16x32xf32, #tpu.memory_space<vmem>>, vector<16x32xf32>
      %cst_10 = arith.constant dense<0.000000e+00> : vector<16xf32>
      %11 = vector.multi_reduction <add>, %10, %cst_10 [1] : vector<16x32xf32> to vector<16xf32>
      %12 = vector.shape_cast %11 : vector<16xf32> to vector<16x1xf32>
      %cst_11 = arith.constant 3.200000e+01 : f32
      %13 = vector.broadcast %cst_11 : f32 to vector<16x1xf32>
      %14 = arith.divf %12, %13 : vector<16x1xf32>
      %15 = vector.broadcast %14 : vector<16x1xf32> to vector<16x32xf32>
      %16 = arith.subf %10, %15 : vector<16x32xf32>
      %17 = arith.mulf %16, %16 : vector<16x32xf32>
      %cst_12 = arith.constant dense<0.000000e+00> : vector<16xf32>
      %18 = vector.multi_reduction <add>, %17, %cst_12 [1] : vector<16x32xf32> to vector<16xf32>
      %19 = vector.shape_cast %18 : vector<16xf32> to vector<16x1xf32>
      %cst_13 = arith.constant 3.200000e+01 : f32
      %20 = vector.broadcast %cst_13 : f32 to vector<16x1xf32>
      %21 = arith.divf %19, %20 : vector<16x1xf32>
      %cst_14 = arith.constant 9.99999974E-6 : f32
      %22 = vector.broadcast %cst_14 : f32 to vector<16x1xf32>
      %23 = arith.addf %21, %22 : vector<16x1xf32>
      %24 = math.rsqrt %23 : vector<16x1xf32>
      %25 = vector.broadcast %24 : vector<16x1xf32> to vector<16x32xf32>
      %26 = arith.mulf %16, %25 : vector<16x32xf32>
      %c0_15 = arith.constant 0 : index
      %c0_16 = arith.constant 0 : index
      %27 = vector.load %arg3[%c0_15, %c0_16] : memref<1x32xf32, #tpu.memory_space<vmem>>, vector<1x32xf32>
      %28 = vector.broadcast %27 : vector<1x32xf32> to vector<16x32xf32>
      %29 = arith.mulf %26, %28 : vector<16x32xf32>
      %c0_17 = arith.constant 0 : index
      %c0_18 = arith.constant 0 : index
      %30 = vector.load %arg4[%c0_17, %c0_18] : memref<1x32xf32, #tpu.memory_space<vmem>>, vector<1x32xf32>
      %31 = vector.broadcast %30 : vector<1x32xf32> to vector<16x32xf32>
      %32 = arith.addf %29, %31 : vector<16x32xf32>
      %c0_19 = arith.constant 0 : index
      %c0_20 = arith.constant 0 : index
      %33 = vector.load %arg8[%c0_19, %c0_20] : memref<16x32xf32, #tpu.memory_space<vmem>>, vector<16x32xf32>
      tpu.vector_store %arg8[%c0_19, %c0_20], %32 {strides = array<i32>} : memref<16x32xf32, #tpu.memory_space<vmem>>, vector<16x32xf32>,
    } else {
    }
    %c0 = arith.constant 0 : index
    %c0_1 = arith.constant 0 : index
    %3 = vector.load %arg8[%c0, %c0_1] : memref<16x32xf32, #tpu.memory_space<vmem>>, vector<16x32xf32>
    %c0_2 = arith.constant 0 : index
    %c0_3 = arith.constant 0 : index
    %4 = vector.load %arg5[%c0_2, %c0_3] : memref<32x96xf32, #tpu.memory_space<vmem>>, vector<32x96xf32>
    %cst = arith.constant dense<0.000000e+00> : vector<16x96xf32>
    %5 = tpu.matmul %3, %4, %cst {dimension_numbers = #tpu.dot_dimension_numbers<[1], [0], [0], [1], [0, 0, 1, 1], [], []>} : vector<16x32xf32>, vector<32x96xf32>, vector<16x96xf32> -> vector<16x96xf32>
    %c0_4 = arith.constant 0 : index
    %c0_5 = arith.constant 0 : index
    %6 = vector.load %arg6[%c0_4, %c0_5] : memref<1x96xf32, #tpu.memory_space<vmem>>, vector<1x96xf32>
    %7 = vector.broadcast %6 : vector<1x96xf32> to vector<16x96xf32>
    %8 = arith.addf %5, %7 : vector<16x96xf32>
    %c0_6 = arith.constant 0 : index
    %c0_7 = arith.constant 0 : index
    %9 = vector.load %arg7[%c0_6, %c0_7] : memref<16x96xf32, #tpu.memory_space<vmem>>, vector<16x96xf32>
    tpu.vector_store %arg7[%c0_6, %c0_7], %8 {strides = array<i32>} : memref<16x96xf32, #tpu.memory_space<vmem>>, vector<16x96xf32>,
    return
  }
  func.func @transform_0(%arg0: i32, %arg1: i32) -> (i32, i32) {
    %c0_i32 = arith.constant 0 : i32
    %c0_i32_0 = arith.constant 0 : i32
    return %arg0, %c0_i32 : i32, i32
  }
  func.func @transform_1(%arg0: i32, %arg1: i32) -> (i32, i32) {
    %c0_i32 = arith.constant 0 : i32
    %c0_i32_0 = arith.constant 0 : i32
    %c0_i32_1 = arith.constant 0 : i32
    return %c0_i32, %c0_i32_0 : i32, i32
  }
  func.func @transform_2(%arg0: i32, %arg1: i32) -> (i32, i32) {
    %c0_i32 = arith.constant 0 : i32
    %c0_i32_0 = arith.constant 0 : i32
    %c0_i32_1 = arith.constant 0 : i32
    return %c0_i32, %c0_i32_0 : i32, i32
  }
  func.func @transform_3(%arg0: i32, %arg1: i32) -> (i32, i32) {
    %c0_i32 = arith.constant 0 : i32
    %c0_i32_0 = arith.constant 0 : i32
    return %c0_i32, %arg1 : i32, i32
  }
  func.func @transform_4(%arg0: i32, %arg1: i32) -> (i32, i32) {
    %c0_i32 = arith.constant 0 : i32
    %c0_i32_0 = arith.constant 0 : i32
    return %c0_i32, %arg1 : i32, i32
  }
  func.func @transform_5(%arg0: i32, %arg1: i32) -> (i32, i32) {
    %c0_i32 = arith.constant 0 : i32
    return %arg0, %arg1 : i32, i32
  }
}

</mosaic_0001>

<bundles_post_ra>
// kernel: tpu_custom_call.1
= control target key start
LH: loop header
LB: loop body
LE: loop exit
PB: predicated region body
PF: predicated region fallthrough
CT: control target
= control target key end

     0   :  { %10 = vsyncpa [#allocation4], 0  ;;  %s427_s0 = inlined_call_operand.hbm [shape: f32[16,32], index: 0, kind: input, shape index: {}]   ;;  %s428_s1 = inlined_call_operand.vmem [shape: f32[1,32], index: 1, kind: input, shape index: {}]   ;;  %s429_s2 = inlined_call_operand.vmem [shape: f32[1,32], index: 2, kind: input, shape index: {}]   ;;  %s430_s3 = inlined_call_operand.hbm [shape: f32[32,96], index: 3, kind: input, shape index: {}]   ;;  %s431_s4 = inlined_call_operand.vmem [shape: f32[1,96], index: 4, kind: input, shape index: {}]   ;;  %s432_s5 = inlined_call_operand.hbm [shape: f32[16,96], index: 5, kind: output, shape index: {}]  }
   0x1   :  { %11 = vsyncpa [#allocation7], 0 }
   0x2   :  { %12 = vsyncpa [#allocation5], 0  ;;  %s330_s18 = smov [#allocation3]   ;;  %s258_s22 = scalar_lea.hbm %s427_s0, 256 }
   0x3   :  { %s18_s19 = sshll.u32 %s330_s18, 4  ;;  %p259_p0 = scmp.ne.s32.totalorder %s427_s0, %s258_s22  ;;  %s19_s19 = int_to_ptr.vmem [resolvable:$true] %s18_s19 }
   0x4   :  { %p262_p1 = scmp.lt.u32.totalorder %s258_s22, %s427_s0 }
   0x6   :  { %p264_p2 = pnand %p262_p1, %p259_p0 }
   0x8   :  { %267 = shalt.err (!%p264_p2)
}
   0x9   :  { %s268_s27 = scalar_lea.vmem %s19_s19, 256  ;;  %p273_p4 = scmp.lt.s32.totalorder %s19_s19, %s19_s19 }
   0xa   :  { %p269_p3 = scmp.ne.s32.totalorder %s19_s19, %s268_s27  ;;  %p274_p5 = scmp.lt.s32.totalorder %s268_s27, %s268_s27 }
   0xc   :  { %p275_p6 = por %p274_p5, %p273_p4 }
   0xe   :  { %p276_p7 = pnand %p275_p6, %p269_p3 }
  0x10   :  { %279 = shalt.err (!%p276_p7)
}
  0x11   :  { %s331_s28 = smov 128   ;;  %s332_s29 = smov 8  }
  0x12   :  { %24 = dma.hbm_to_vmem [thread:$0]  %s427_s0, 256, %s19_s19, [#allocation4], %s331_s28, %s331_s28, %s332_s29  }
  0x13   :  { %s333_s7 = smov [#allocation6]   ;;  %s280_s11 = scalar_lea.hbm %s430_s3, 512 }
  0x14   :  { %s34_s8 = sshll.u32 %s333_s7, 4  ;;  %p281_p8 = scmp.ne.s32.totalorder %s430_s3, %s280_s11  ;;  %s35_s8 = int_to_ptr.vmem [resolvable:$true] %s34_s8 }
  0x15   :  { %p284_p9 = scmp.lt.u32.totalorder %s280_s11, %s430_s3 }
  0x17   :  { %p286_p10 = pnand %p284_p9, %p281_p8 }
  0x19   :  { %289 = shalt.err (!%p286_p10)
}
  0x1a   :  { %s290_s16 = scalar_lea.vmem %s35_s8, 512  ;;  %p295_p12 = scmp.lt.s32.totalorder %s35_s8, %s35_s8 }
  0x1b   :  { %p291_p11 = scmp.ne.s32.totalorder %s35_s8, %s290_s16  ;;  %p296_p13 = scmp.lt.s32.totalorder %s290_s16, %s290_s16 }
  0x1d   :  { %p297_p0 = por %p296_p13, %p295_p12 }
  0x1f   :  { %p298_p1 = pnand %p297_p0, %p291_p11 }
  0x21   :  { %301 = shalt.err (!%p298_p1)
}
  0x22   :  { %40 = dma.hbm_to_vmem [thread:$0]  %s430_s3, 512, %s35_s8, [#allocation7], %s331_s28, %s331_s28, %s332_s29  }
  0x23   :  { %324 = dma.done.wait [#allocation4], 256  }
  0x24   :  { %325 = vsyncadd [#allocation4], 4294967040 }
  0x25   :  { %326 = dma.done.wait [#allocation7], 512  }
  0x26   :  { %327 = vsyncadd [#allocation7], 4294966784  ;;  %vm55_vm0 = vcmask 261120   ;;  %v53_v0 = vld [vmem:[#allocation3] sm:$0xff]  ;;  %v54_v1 = vld [vmem:[#allocation3 + $0x8] sm:$0xff]  ;;  %vm198_vm1 = vcmask 785408  }
  0x27   :  { %v56_v2 = vsel %vm55_vm0, %v53_v0, 0.0  ;;  %v59_v3 = vsel %vm55_vm0, %v54_v1, 0.0  ;;  %v105_v14 = vld [vmem:[#allocation6] sm:$0xff]  ;;  %v106_v15 = vld [vmem:[#allocation6 + $0x8] sm:$0xff]  ;;  %v107_v17 = vld [vmem:[#allocation6 + $0x10] sm:$0xff] }
  0x28   :  { %57 = vadd.xlane.f32.xlu0 %v56_v2  ;;  %v241_v16 = vpack.c.bf16 %v106_v15, %v105_v14  ;;  %v108_v18 = vld [vmem:[#allocation6 + $0x18] sm:$0xff]  ;;  %v219_v27 = vld [vmem:[%s428_s1] ss:$0 sm:$0xff] }
  0x29   :  { %v245_v19 = vpack.c.bf16 %v108_v18, %v107_v17  ;;  %v220_v29 = vld [vmem:[%s429_s2] ss:$0 sm:$0xff]  ;;  %s334_s2 = smov [#allocation8]  }
  0x2a   :  { %242 = vmatprep.subr.bf16.mxu0 %v241_v16  ;;  %v221_v38 = vld [vmem:[%s431_s4] ss:$0 sm:$0xff]  ;;  %s206_s22 = sshll.u32 %s334_s2, 4  ;;  %s207_s22 = int_to_ptr.vmem [resolvable:$true] %s206_s22 }
  0x2b   :  { %244 = vmatpush3.bf16.msra.mxu0 %v241_v16  ;;  %s302_s23 = scalar_lea.vmem %s207_s22, 256  ;;  %p307_p3 = scmp.lt.s32.totalorder %s207_s22, %s207_s22 }
  0x2c   :  { %60 = vadd.xlane.f32.xlu0 %v59_v3  ;;  %246 = vmatprep.subr.bf16.mxu0 %v245_v19  ;;  %p303_p2 = scmp.ne.s32.totalorder %s207_s22, %s302_s23  ;;  %p308_p4 = scmp.lt.s32.totalorder %s302_s23, %s302_s23 }
  0x2e   :  { %p309_p5 = por %p308_p4, %p307_p3 }
  0x2f   :  { %248 = vmatpush3.bf16.msra.mxu0 %v245_v19 }
  0x30   :  { %p310_p6 = pnand %p309_p5, %p303_p2 }
  0xb5   :  { %v58_v4 = vpop.xlane.xlu0 %57 }
  0xb6   :  { %v63_v5 = vmul.f32 0.03125, %v58_v4 }
  0xb8   :  { %v65_v6 = vsub.f32 %v53_v0, %v63_v5 }
  0xb9   :  { %v61_v7 = vpop.xlane.xlu0 %60 }
  0xba   :  { %v64_v8 = vmul.f32 0.03125, %v61_v7  ;;  %v67_v9 = vmul.f32 %v65_v6, %v65_v6 }
  0xbc   :  { %v66_v10 = vsub.f32 %v54_v1, %v64_v8  ;;  %v69_v11 = vsel %vm55_vm0, %v67_v9, 0.0 }
  0xbd   :  { %70 = vadd.xlane.f32.xlu1 %v69_v11 }
  0xbe   :  { %v68_v12 = vmul.f32 %v66_v10, %v66_v10 }
  0xc0   :  { %v72_v13 = vsel %vm55_vm0, %v68_v12, 0.0 }
  0xc1   :  { %73 = vadd.xlane.f32.xlu1 %v72_v13 }
 0x14a   :  { %v71_v20 = vpop.xlane.xlu1 %70 }
 0x14b   :  { %v75_v21 = vmul.f32 0.03125, %v71_v20 }
 0x14d   :  { %v77_v22 = vadd.f32 1e-05, %v75_v21 }
 0x14e   :  { %v74_v23 = vpop.xlane.xlu1 %73 }
 0x14f   :  { %254 = vrsqrt.f32 %v77_v22  ;;  %v76_v24 = vmul.f32 0.03125, %v74_v23 }
 0x151   :  { %v78_v25 = vadd.f32 1e-05, %v76_v24 }
 0x153   :  { %256 = vrsqrt.f32 %v78_v25 }
 0x159   :  { %v255_v26 = vpop.eup %254 }
 0x15a   :  { %v81_v28 = vmul.f32 %v255_v26, %v65_v6 }
 0x15c   :  { %v90_v30 = vmul.f32 %v219_v27, %v81_v28 }
 0x15d   :  { %v257_v31 = vpop.eup %256 }
 0x15e   :  { %v99_v32 = vadd.f32 %v220_v29, %v90_v30  ;;  %v82_v33 = vmul.f32 %v257_v31, %v66_v10 }
 0x160   :  { %101 = vst.msk [vmem:[#allocation2] sm:$0xff] %vm55_vm0, %v99_v32  ;;  %v91_v34 = vmul.f32 %v219_v27, %v82_v33 }
 0x162   :  { %v100_v35 = vadd.f32 %v220_v29, %v91_v34 }
 0x164   :  { %102 = vst.msk [vmem:[#allocation2 + $0x8] sm:$0xff] %vm55_vm0, %v100_v35 }
 0x167   :  { %v103_v36 = vld [vmem:[#allocation2] sm:$0xff] }
 0x168   :  { %238 = vmatprep.mubr.msk.f32.mxu0 %vm55_vm0, %v103_v36 }
 0x16b   :  { %v104_v37 = vld [vmem:[#allocation2 + $0x8] sm:$0xff] }
 0x16c   :  { %239 = vmatmul.mubr.msk.f32.vlgmr.msra.gmra.mrb[0].mxu0 %vm55_vm0, %v104_v37 }
 0x23f   :  { %v240_v39 = vpop.f32.mrb[0].mxu0 }
 0x240   :  { %v195_v40 = vadd.f32 %v240_v39, %v221_v38  ;;  %v189_v41 = vpop.f32.mrb[1].mxu0 }
 0x241   :  { %v190_v42 = vadd.f32 %v221_v38, %v189_v41 }
 0x242   :  { %200 = vst.msk [vmem:[#allocation8 + $0x8] sm:$0xff] %vm198_vm1, %v195_v40 }
 0x243   :  { %199 = vst.msk [vmem:[#allocation8] sm:$0xff] %vm198_vm1, %v190_v42 }
 0x244   :  { %313 = shalt.err (!%p310_p6)
}
 0x245   :  { %s314_s4 = scalar_lea.hbm %s432_s5, 256 }
 0x246   :  { %p315_p7 = scmp.ne.s32.totalorder %s432_s5, %s314_s4  ;;  %p318_p8 = scmp.lt.u32.totalorder %s314_s4, %s432_s5 }
 0x248   :  { %p320_p9 = pnand %p318_p8, %p315_p7 }
 0x24a   :  { %323 = shalt.err (!%p320_p9)
}
 0x24b   :  { %212 = dma.vmem_to_hbm [thread:$0]  %s207_s22, 256, %s432_s5, [#allocation5], %s331_s28, %s331_s28, %s332_s29  }
 0x24c   :  { %328 = dma.done.wait [#allocation5], 256  }
 0x24d   :  { %329 = vsyncadd [#allocation5], 4294967040 }
 0x24e   :  { %216 = vsyncpa [#allocation4], 1 }
 0x24f   :  { %217 = vsyncpa [#allocation7], 1 }
 0x250   :  { %218 = vsyncpa [#allocation5], 1 }

</bundles_post_ra>
